<compile_context>
chip_gen: v6e
topology: v6e:2x2x1
jax: 0.10.0
libtpu: 0.0.40
codegen_flags: <defaults>
</compile_context>

<pallas_src>
import numpy as np
import jax
import jax.numpy as jnp
from jax.experimental import pallas as pl
from jax.experimental.pallas import tpu as pltpu


# ----------------------------------------------------------------------------
# Kernel construction (mirrors the torch utility functions).
# ----------------------------------------------------------------------------
def _sobel_kernel_3x3() -> np.ndarray:
    return np.array([[-1.0, 0.0, 1.0],
                     [-2.0, 0.0, 2.0],
                     [-1.0, 0.0, 1.0]], dtype=np.float64)


def _scharr_kernel_3x3() -> np.ndarray:
    return np.array([[-47.0, 0.0, 47.0],
                     [-162.0, 0.0, 162.0],
                     [-47.0, 0.0, 47.0]], dtype=np.float64)


def _diff_kernel_3x3() -> np.ndarray:
    return np.array([[0.0, 0.0, 0.0],
                     [-1.0, 0.0, 1.0],
                     [0.0, 0.0, 0.0]], dtype=np.float64)


# Separable factors: kernel_x = outer([a, b, a], [-1, 0, 1]); kernel_y = kx.T
_SEPARABLE = {"sobel": (1.0, 2.0), "scharr": (47.0, 162.0), "diff": (0.0, 1.0)}


def _build_kernel2d(mode: str, coord: str = "xy") -> np.ndarray:
    """Stacked (2, 3, 3) [kernel_x, kernel_y]; coord only matters for scharr
    (exactly like the torch `get_spatial_gradient_kernel2d` for order=1)."""
    kx = {"sobel": _sobel_kernel_3x3,
          "scharr": _scharr_kernel_3x3,
          "diff": _diff_kernel_3x3}[mode]()
    ky = kx.T
    if mode == "scharr" and coord == "ij":
        return np.stack([ky, kx]).astype(np.float32)
    return np.stack([kx, ky]).astype(np.float32)


# ----------------------------------------------------------------------------
# Pallas kernel
# ----------------------------------------------------------------------------
def _mul(c: float, v):
    """Static-scalar multiply that skips the op when the scalar is 1."""
    return v if c == 1.0 else c * v


def _make_grad_kernel(H: int, W: int, a: float, b: float, swap: bool):
    """Build a kernel operating on a (TBC, H*W) lane-dense block.

    Each sublane row of the block is one full image flattened row-major, so:
      * W-direction neighbors are lane rolls by +-1 (replicate at col 0 / W-1)
      * H-direction neighbors are lane rolls by +-W (replicate at row 0 / H-1)
    All shifts are pltpu.roll (XLU); replicate padding is an edge-mask select.
    `a`, `b` already include the 1/sum(|k|) normalization factor.
    """
    HW = H * W
    a, b = float(a), float(b)

    def grad_kernel(x_ref, o_ref):
        x = x_ref[...]                                   # (TBC, HW) f32
        tbc = x.shape[0]
        col = jax.lax.broadcasted_iota(jnp.int32, (tbc, HW), 1)
        cm = col % W
        is_l = cm == 0                                   # left image column
        is_r = cm == (W - 1)                             # right image column
        is_t = col < W                                   # top image row
        is_b = col >= (H - 1) * W                        # bottom image row

        # H-direction neighbors (stride-W lane rolls), replicate-clamped.
        x_up = jnp.where(is_t, x, pltpu.roll(x, W, axis=1))        # x[i-1, j]
        x_dn = jnp.where(is_b, x, pltpu.roll(x, HW - W, axis=1))   # x[i+1, j]

        # Separable vertical factors shared by both channels.
        if a != 0.0:
            s = _mul(a, x_up + x_dn) + _mul(b, x)        # vertical smooth
        else:
            s = _mul(b, x)
        d = x_dn - x_up                                  # vertical diff

        # W-direction neighbors (stride-1 lane rolls), replicate-clamped.
        s_l = jnp.where(is_l, s, pltpu.roll(s, 1, axis=1))          # s[i, j-1]
        s_r = jnp.where(is_r, s, pltpu.roll(s, HW - 1, axis=1))     # s[i, j+1]
        gx = s_r - s_l                                   # kernel_x response

        if a != 0.0:
            d_l = jnp.where(is_l, d, pltpu.roll(d, 1, axis=1))
            d_r = jnp.where(is_r, d, pltpu.roll(d, HW - 1, axis=1))
            gy = _mul(a, d_l + d_r) + _mul(b, d)         # kernel_y response
        else:
            gy = _mul(b, d)

        if swap:                                         # scharr + coord == 'ij'
            gx, gy = gy, gx

        # Lane-dense stores; (TBC, 2*HW) slab is row-major identical to
        # (TBC, 2, H, W), so the wrapper reshape is free.
        o_ref[:, :HW] = gx
        o_ref[:, HW:] = gy

    return grad_kernel


def _choose_tbc(N: int, HW: int) -> int:
    """Images per grid step. Second-to-last block dim must be a multiple of 8
    or equal to the full array dim N."""
    max_block_elems = 128 * 1024           # ~512 KiB f32 per (TBC, HW) temp
    if N <= 8:
        return N
    cap = max(8, max_block_elems // HW)
    t = (min(cap, N) // 8) * 8
    while t >= 8:
        if N % t == 0:
            return t
        t -= 8
    # TODO(synk): tile along H with a 1-row halo for very large single images
    # (keeps blocks bounded when N has no usable multiple-of-8 divisor).
    return N


def spatial_gradient(x: jax.Array,
                     mode: str = "sobel",
                     order: int = 1,
                     normalized: bool = True,
                     coord: str = "xy") -> jax.Array:
    """Pallas implementation of SpatialGradient.forward (order=1).

    x: (B, C, H, W) -> (B, C, 2, H, W) float32
    """
    if order != 1:
        # TODO(synk): order=2 (2nd-order kernels, 3 output channels) not implemented.
        raise NotImplementedError("only order=1 supported")
    if mode not in _SEPARABLE:
        raise TypeError(f"mode should be sobel, scharr or diff. Got {mode}")
    if coord not in ("xy", "ij"):
        raise ValueError(f"coord should be 'xy' or 'ij'. Got {coord}")

    B, C, H, W = x.shape
    N, HW = B * C, H * W
    a, b = _SEPARABLE[mode]
    if normalized:
        scale = 1.0 / (2.0 * (2.0 * a + b))   # 1 / sum(|kernel|) per channel
    else:
        scale = 1.0
    a, b = a * scale, b * scale               # fold normalization into coeffs
    swap = (mode == "scharr") and (coord == "ij")   # torch: coord only for scharr

    tbc = _choose_tbc(N, HW)
    grid = (N // tbc,)

    kernel = _make_grad_kernel(H, W, a, b, swap)

    # Free reshape only -- no padding / transpose passes through HBM.
    x2 = x.reshape(N, HW).astype(jnp.float32)

    out = pl.pallas_call(
        kernel,
        out_shape=jax.ShapeDtypeStruct((N, 2 * HW), jnp.float32),
        grid_spec=pltpu.PrefetchScalarGridSpec(
            num_scalar_prefetch=0,
            grid=grid,
            in_specs=[pl.BlockSpec((tbc, HW), lambda i: (i, 0))],
            out_specs=pl.BlockSpec((tbc, 2 * HW), lambda i: (i, 0)),
        ),
        compiler_params=pltpu.CompilerParams(
            dimension_semantics=("parallel",),
            vmem_limit_bytes=32 * 1024 * 1024,
        ),
        cost_estimate=pl.CostEstimate(
            flops=20 * N * HW,
            transcendentals=0,
            bytes_accessed=12 * N * HW,
        ),
    )(x2)

    # (N, 2*HW) is row-major identical to (B, C, 2, H, W) -> free reshape.
    return out.reshape(B, C, 2, H, W)


# ----------------------------------------------------------------------------
# Pure-JAX reference (edge pad + 9-tap cross-correlation) for validation.
# ----------------------------------------------------------------------------
def _reference_spatial_gradient(x, mode="sobel", normalized=True, coord="xy"):
    kernel = _build_kernel2d(mode, coord)
    if normalized:
        kernel = kernel / np.abs(kernel).sum(axis=(-2, -1), keepdims=True)
    B, C, H, W = x.shape
    xp = jnp.pad(x.astype(jnp.float32), ((0, 0), (0, 0), (1, 1), (1, 1)),
                 mode="edge")
    chans = []
    for oc in range(2):
        acc = jnp.zeros((B, C, H, W), jnp.float32)
        for ki in range(3):
            for kj in range(3):
                wv = float(kernel[oc, ki, kj])
                if wv != 0.0:
                    acc = acc + wv * xp[:, :, ki:ki + H, kj:kj + W]
        chans.append(acc)
    return jnp.stack(chans, axis=2)


if __name__ == "__main__":
    key = jax.random.PRNGKey(0)
    B, C, H, W = 2, 4, 16, 16
    x = jax.random.uniform(key, (B, C, H, W), dtype=jnp.float32)

    # Module defaults: mode='sobel', order=1, normalized=True, coord='xy'
    out = spatial_gradient(x)
    out = jax.block_until_ready(out)
    assert out.shape == (B, C, 2, H, W)
    assert out.dtype == jnp.float32
    ref = jax.block_until_ready(_reference_spatial_gradient(x))
    err = float(jnp.max(jnp.abs(out - ref)))
    assert err < 1e-5, f"sobel max abs error vs reference: {err}"

    # Scharr + coord='ij' exercises the different coefficients and channel swap.
    out2 = jax.block_until_ready(spatial_gradient(x, mode="scharr", coord="ij"))
    ref2 = jax.block_until_ready(
        _reference_spatial_gradient(x, mode="scharr", coord="ij"))
    err2 = float(jnp.max(jnp.abs(out2 - ref2)))
    assert err2 < 1e-5, f"scharr max abs error vs reference: {err2}"

    print("KERNEL_OK")
</pallas_src>

<mosaic_0001>
module attributes {stable_mosaic.version = 11 : i64} {
  func.func @grad_kernel(%arg0: i32, %arg1: memref<8x256xf32, #tpu.memory_space<vmem>>, %arg2: memref<8x512xf32, #tpu.memory_space<vmem>>) attributes {dimension_semantics = [#tpu.dimension_semantics<parallel>], iteration_bounds = array<i64: 1>, scalar_prefetch = 0 : i64, scratch_operands = 0 : i64, tpu.core_type = #tpu.core_type<tc>, window_params = [{transform_indices = @transform_0, window_bounds = array<i64: 8, 256>}, {transform_indices = @transform_1, window_bounds = array<i64: 8, 512>}]} {
    %c0 = arith.constant 0 : index
    %c0_0 = arith.constant 0 : index
    %0 = vector.load %arg1[%c0, %c0_0] : memref<8x256xf32, #tpu.memory_space<vmem>>, vector<8x256xf32>
    %1 = tpu.iota {dimensions = array<i32: 1>} : vector<8x256xi32>
    %c16_i32 = arith.constant 16 : i32
    %c0_i32 = arith.constant 0 : i32
    %2 = arith.cmpi eq, %c16_i32, %c0_i32 : i32
    %c1_i32 = arith.constant 1 : i32
    %3 = arith.select %2, %c1_i32, %c16_i32 : i32
    %4 = vector.broadcast %3 : i32 to vector<8x256xi32>
    %5 = arith.remsi %1, %4 : vector<8x256xi32>
    %c0_i32_1 = arith.constant 0 : i32
    %6 = vector.broadcast %c0_i32_1 : i32 to vector<8x256xi32>
    %7 = arith.cmpi ne, %5, %6 : vector<8x256xi32>
    %c0_i32_2 = arith.constant 0 : i32
    %8 = vector.broadcast %c0_i32_2 : i32 to vector<8x256xi32>
    %9 = arith.cmpi slt, %5, %8 : vector<8x256xi32>
    %c0_i32_3 = arith.constant 0 : i32
    %10 = arith.cmpi slt, %3, %c0_i32_3 : i32
    %11 = vector.broadcast %10 : i1 to vector<8x256xi1>
    %12 = vector.broadcast %11 : vector<8x256xi1> to vector<8x256xi1>
    %13 = arith.xori %9, %12 : vector<8x256xi1>
    %14 = arith.andi %13, %7 : vector<8x256xi1>
    %15 = vector.broadcast %3 : i32 to vector<8x256xi32>
    %16 = arith.addi %5, %15 : vector<8x256xi32>
    %17 = arith.select %14, %16, %5 : vector<8x256xi1>, vector<8x256xi32>
    %c0_i32_4 = arith.constant 0 : i32
    %18 = vector.broadcast %c0_i32_4 : i32 to vector<8x256xi32>
    %19 = arith.cmpi eq, %17, %18 : vector<8x256xi32>
    %c15_i32 = arith.constant 15 : i32
    %20 = vector.broadcast %c15_i32 : i32 to vector<8x256xi32>
    %21 = arith.cmpi eq, %17, %20 : vector<8x256xi32>
    %c16_i32_5 = arith.constant 16 : i32
    %22 = vector.broadcast %c16_i32_5 : i32 to vector<8x256xi32>
    %23 = arith.cmpi slt, %1, %22 : vector<8x256xi32>
    %c240_i32 = arith.constant 240 : i32
    %24 = vector.broadcast %c240_i32 : i32 to vector<8x256xi32>
    %25 = arith.cmpi sge, %1, %24 : vector<8x256xi32>
    %c16_i32_6 = arith.constant 16 : i32
    %26 = tpu.dynamic_rotate %0 by %c16_i32_6 dim 1 : vector<8x256xf32>, i32 -> vector<8x256xf32>
    %27 = arith.select %23, %0, %26 : vector<8x256xi1>, vector<8x256xf32>
    %c240_i32_7 = arith.constant 240 : i32
    %28 = tpu.dynamic_rotate %0 by %c240_i32_7 dim 1 : vector<8x256xf32>, i32 -> vector<8x256xf32>
    %29 = arith.select %25, %0, %28 : vector<8x256xi1>, vector<8x256xf32>
    %30 = arith.addf %27, %29 : vector<8x256xf32>
    %cst = arith.constant 1.250000e-01 : f32
    %31 = vector.broadcast %cst : f32 to vector<8x256xf32>
    %32 = arith.mulf %31, %30 : vector<8x256xf32>
    %cst_8 = arith.constant 2.500000e-01 : f32
    %33 = vector.broadcast %cst_8 : f32 to vector<8x256xf32>
    %34 = arith.mulf %33, %0 : vector<8x256xf32>
    %35 = arith.addf %32, %34 : vector<8x256xf32>
    %36 = arith.subf %29, %27 : vector<8x256xf32>
    %c1_i32_9 = arith.constant 1 : i32
    %37 = tpu.dynamic_rotate %35 by %c1_i32_9 dim 1 : vector<8x256xf32>, i32 -> vector<8x256xf32>
    %38 = arith.select %19, %35, %37 : vector<8x256xi1>, vector<8x256xf32>
    %c255_i32 = arith.constant 255 : i32
    %39 = tpu.dynamic_rotate %35 by %c255_i32 dim 1 : vector<8x256xf32>, i32 -> vector<8x256xf32>
    %40 = arith.select %21, %35, %39 : vector<8x256xi1>, vector<8x256xf32>
    %41 = arith.subf %40, %38 : vector<8x256xf32>
    %c1_i32_10 = arith.constant 1 : i32
    %42 = tpu.dynamic_rotate %36 by %c1_i32_10 dim 1 : vector<8x256xf32>, i32 -> vector<8x256xf32>
    %43 = arith.select %19, %36, %42 : vector<8x256xi1>, vector<8x256xf32>
    %c255_i32_11 = arith.constant 255 : i32
    %44 = tpu.dynamic_rotate %36 by %c255_i32_11 dim 1 : vector<8x256xf32>, i32 -> vector<8x256xf32>
    %45 = arith.select %21, %36, %44 : vector<8x256xi1>, vector<8x256xf32>
    %46 = arith.addf %43, %45 : vector<8x256xf32>
    %cst_12 = arith.constant 1.250000e-01 : f32
    %47 = vector.broadcast %cst_12 : f32 to vector<8x256xf32>
    %48 = arith.mulf %47, %46 : vector<8x256xf32>
    %cst_13 = arith.constant 2.500000e-01 : f32
    %49 = vector.broadcast %cst_13 : f32 to vector<8x256xf32>
    %50 = arith.mulf %49, %36 : vector<8x256xf32>
    %51 = arith.addf %48, %50 : vector<8x256xf32>
    %c0_14 = arith.constant 0 : index
    %c0_15 = arith.constant 0 : index
    %52 = vector.load %arg2[%c0_14, %c0_15] : memref<8x512xf32, #tpu.memory_space<vmem>>, vector<8x256xf32>
    tpu.vector_store %arg2[%c0_14, %c0_15], %41 {strides = array<i32>} : memref<8x512xf32, #tpu.memory_space<vmem>>, vector<8x256xf32>,
    %c0_16 = arith.constant 0 : index
    %c256 = arith.constant 256 : index
    %53 = vector.load %arg2[%c0_16, %c256] : memref<8x512xf32, #tpu.memory_space<vmem>>, vector<8x256xf32>
    tpu.vector_store %arg2[%c0_16, %c256], %51 {strides = array<i32>} : memref<8x512xf32, #tpu.memory_space<vmem>>, vector<8x256xf32>,
    return
  }
  func.func @transform_0(%arg0: i32) -> (i32, i32) {
    %c0_i32 = arith.constant 0 : i32
    %c0_i32_0 = arith.constant 0 : i32
    return %arg0, %c0_i32 : i32, i32
  }
  func.func @transform_1(%arg0: i32) -> (i32, i32) {
    %c0_i32 = arith.constant 0 : i32
    %c0_i32_0 = arith.constant 0 : i32
    return %arg0, %c0_i32 : i32, i32
  }
}

</mosaic_0001>

<bundles_post_ra>
// kernel: tpu_custom_call.1
= control target key start
LH: loop header
LB: loop body
LE: loop exit
PB: predicated region body
PF: predicated region fallthrough
CT: control target
= control target key end

     0   :  { %6 = vsyncpa [#allocation3], 0  ;;  %s276_s0 = inlined_call_operand.hbm [shape: f32[8,256], index: 0, kind: input, shape index: {}]   ;;  %s277_s1 = inlined_call_operand.hbm [shape: f32[8,512], index: 1, kind: output, shape index: {}]  }
   0x1   :  { %7 = vsyncpa [#allocation4], 0  ;;  %s198_s6 = smov [#allocation2]  }
   0x2   :  { %s14_s7 = sshll.u32 %s198_s6, 4  ;;  %s15_s7 = int_to_ptr.vmem [resolvable:$true] %s14_s7 }
   0x3   :  { %s162_s8 = scalar_lea.vmem %s15_s7, 256  ;;  %p167_p1 = scmp.lt.s32.totalorder %s15_s7, %s15_s7 }
   0x4   :  { %p163_p0 = scmp.ne.s32.totalorder %s15_s7, %s162_s8  ;;  %p168_p2 = scmp.lt.s32.totalorder %s162_s8, %s162_s8 }
   0x6   :  { %p169_p3 = por %p168_p2, %p167_p1 }
   0x8   :  { %p170_p4 = pnand %p169_p3, %p163_p0 }
   0xa   :  { %173 = shalt.err (!%p170_p4)
}
   0xb   :  { %17 = dma.hbm_to_vmem [thread:$0]  %s276_s0, 256, %s15_s7, [#allocation3]  }
   0xc   :  { %194 = dma.done.wait [#allocation3], 256  }
   0xd   :  { %195 = vsyncadd [#allocation3], 4294967040  ;;  %v21_v0 = vld [vmem:[#allocation2] sm:$0xff]  ;;  %s199_s11 = smov 112   ;;  %s200_s12 = smov 16   ;;  %v22_v1 = vld [vmem:[#allocation2 + $0x8] sm:$0xff]  ;;  %v23_v2 = vlaneseq }
   0xe   :  { %66 = vrot.lane.b32.xlu1 %v21_v0, %s199_s11  ;;  %58 = vrot.lane.b32.xlu0 %v21_v0, %s200_s12  ;;  %s201_s0 = smov 1   ;;  %v79_v19 = vmul.f32 0.25, %v21_v0  ;;  %v80_v20 = vmul.f32 0.25, %v22_v1  ;;  %s202_s13 = smov 127  }
   0xf   :  { %v217_v3 = vand.u32 127, %v23_v2  ;;  %s203_s14 = smov [#allocation5]  }
  0x10   :  { %s139_s15 = sshll.u32 %s203_s14, 4  ;;  %s140_s15 = int_to_ptr.vmem [resolvable:$true] %s139_s15 }
  0x11   :  { %v25_v4 = vadd.s32 128, %v217_v3  ;;  %vm70_vm0 = vcmp.lt.s32.totalorder %v217_v3, 112  ;;  %vm54_vm1 = vcmp.lt.s32.totalorder %v217_v3, 16  ;;  %v30_v25 = vand.u32 15, %v217_v3  ;;  %s174_s16 = scalar_lea.vmem %s140_s15, 512  ;;  %p179_p6 = scmp.lt.s32.totalorder %s140_s15, %s140_s15 }
  0x12   :  { %68 = vrot.lane.b32.xlu1 %v22_v1, %s199_s11  ;;  %60 = vrot.lane.b32.xlu0 %v22_v1, %s200_s12  ;;  %vm89_vm3 = vcmp.lt.s32.totalorder %v217_v3, 1  ;;  %vm98_vm6 = vcmp.lt.s32.totalorder %v217_v3, 127  ;;  %p175_p5 = scmp.ne.s32.totalorder %s140_s15, %s174_s16  ;;  %p180_p7 = scmp.lt.s32.totalorder %s174_s16, %s174_s16 }
  0x13   :  { %vm57_vm2 = vcmp.ge.s32.totalorder %v25_v4, 240  ;;  %v37_v26 = vand.u32 15, %v25_v4  ;;  %vm224_vm4 = vcmp.eq.s32.totalorder %v30_v25, 0  ;;  %vm237_vm7 = vcmp.eq.s32.totalorder %v30_v25, 15 }
  0x14   :  { %p181_p8 = por %p180_p7, %p179_p6 }
  0x15   :  { %vm228_vm5 = vcmp.eq.s32.totalorder %v37_v26, 0  ;;  %vm241_vm8 = vcmp.eq.s32.totalorder %v37_v26, 15 }
  0x16   :  { %p182_p9 = pnand %p181_p8, %p175_p5 }
  0x80   :  { %v67_v5 = vpop.permute.xlu1 %66  ;;  %v59_v6 = vpop.permute.xlu0 %58 }
  0x84   :  { %v69_v7 = vpop.permute.xlu1 %68  ;;  %v61_v8 = vpop.permute.xlu0 %60 }
  0x85   :  { %v71_v9 = vsel %vm70_vm0, %v67_v5, %v69_v7  ;;  %v72_v10 = vsel %vm70_vm0, %v69_v7, %v67_v5  ;;  %v62_v11 = vsel %vm54_vm1, %v59_v6, %v61_v8  ;;  %v63_v12 = vsel %vm54_vm1, %v61_v8, %v59_v6 }
  0x86   :  { %v74_v13 = vsel %vm57_vm2, %v22_v1, %v72_v10  ;;  %v64_v14 = vsel %vm54_vm1, %v21_v0, %v63_v12 }
  0x87   :  { %v75_v15 = vadd.f32 %v71_v9, %v64_v14  ;;  %v76_v16 = vadd.f32 %v74_v13, %v62_v11  ;;  %v83_v17 = vsub.f32 %v71_v9, %v64_v14  ;;  %v84_v18 = vsub.f32 %v74_v13, %v62_v11 }
  0x89   :  { %105 = vrot.lane.b32.xlu0 %v83_v17, %s201_s0  ;;  %107 = vrot.lane.b32.xlu1 %v84_v18, %s201_s0  ;;  %v77_v21 = vmul.f32 0.125, %v75_v15  ;;  %v78_v22 = vmul.f32 0.125, %v76_v16  ;;  %v125_v47 = vmul.f32 0.25, %v83_v17  ;;  %v126_v50 = vmul.f32 0.25, %v84_v18 }
  0x8b   :  { %v82_v23 = vadd.f32 %v80_v20, %v78_v22  ;;  %v81_v24 = vadd.f32 %v79_v19, %v77_v21 }
  0x8d   :  { %113 = vrot.lane.b32.xlu0 %v83_v17, %s202_s13  ;;  %115 = vrot.lane.b32.xlu1 %v84_v18, %s202_s13 }
  0x91   :  { %87 = vrot.lane.b32.xlu1 %v82_v23, %s201_s0  ;;  %85 = vrot.lane.b32.xlu0 %v81_v24, %s201_s0 }
  0x95   :  { %96 = vrot.lane.b32.xlu1 %v82_v23, %s202_s13  ;;  %94 = vrot.lane.b32.xlu0 %v81_v24, %s202_s13 }
  0xfb   :  { %v106_v27 = vpop.permute.xlu0 %105  ;;  %v108_v28 = vpop.permute.xlu1 %107 }
  0xfc   :  { %v109_v31 = vsel %vm89_vm3, %v106_v27, %v108_v28  ;;  %v110_v32 = vsel %vm89_vm3, %v108_v28, %v106_v27 }
  0xfd   :  { %v111_v39 = vsel %vm224_vm4, %v83_v17, %v110_v32  ;;  %v112_v40 = vsel %vm228_vm5, %v84_v18, %v109_v31 }
  0xff   :  { %v114_v35 = vpop.permute.xlu0 %113  ;;  %v116_v36 = vpop.permute.xlu1 %115 }
 0x100   :  { %v117_v37 = vsel %vm98_vm6, %v114_v35, %v116_v36  ;;  %v118_v38 = vsel %vm98_vm6, %v116_v36, %v114_v35 }
 0x101   :  { %v119_v41 = vsel %vm237_vm7, %v83_v17, %v117_v37  ;;  %v120_v42 = vsel %vm241_vm8, %v84_v18, %v118_v38 }
 0x102   :  { %v121_v43 = vadd.f32 %v119_v41, %v111_v39  ;;  %v122_v44 = vadd.f32 %v120_v42, %v112_v40 }
 0x103   :  { %v88_v45 = vpop.permute.xlu1 %87  ;;  %v86_v46 = vpop.permute.xlu0 %85 }
 0x104   :  { %v123_v48 = vmul.f32 0.125, %v121_v43  ;;  %v124_v49 = vmul.f32 0.125, %v122_v44  ;;  %v90_v53 = vsel %vm89_vm3, %v86_v46, %v88_v45  ;;  %v91_v54 = vsel %vm89_vm3, %v88_v45, %v86_v46 }
 0x105   :  { %v92_v59 = vsel %vm224_vm4, %v81_v24, %v91_v54  ;;  %v93_v60 = vsel %vm228_vm5, %v82_v23, %v90_v53 }
 0x106   :  { %v127_v51 = vadd.f32 %v125_v47, %v123_v48  ;;  %v128_v52 = vadd.f32 %v126_v50, %v124_v49 }
 0x107   :  { %v97_v55 = vpop.permute.xlu1 %96  ;;  %v95_v56 = vpop.permute.xlu0 %94 }
 0x108   :  { %131 = vst [vmem:[#allocation5 + $0x10] sm:$0xff] %v127_v51  ;;  %132 = vst [vmem:[#allocation5 + $0x18] sm:$0xff] %v128_v52  ;;  %v99_v57 = vsel %vm98_vm6, %v95_v56, %v97_v55  ;;  %v100_v58 = vsel %vm98_vm6, %v97_v55, %v95_v56 }
 0x109   :  { %v101_v61 = vsel %vm237_vm7, %v81_v24, %v99_v57  ;;  %v102_v62 = vsel %vm241_vm8, %v82_v23, %v100_v58 }
 0x10a   :  { %v103_v63 = vsub.f32 %v101_v61, %v92_v59  ;;  %v104_v0 = vsub.f32 %v102_v62, %v93_v60 }
 0x10c   :  { %129 = vst [vmem:[#allocation5] sm:$0xff] %v103_v63  ;;  %130 = vst [vmem:[#allocation5 + $0x8] sm:$0xff] %v104_v0 }
 0x10d   :  { %185 = shalt.err (!%p182_p9)
}
 0x10e   :  { %142 = dma.vmem_to_hbm [thread:$0]  %s140_s15, 512, %s277_s1, [#allocation4]  }
 0x10f   :  { %196 = dma.done.wait [#allocation4], 512  }
 0x110   :  { %197 = vsyncadd [#allocation4], 4294966784 }
 0x111   :  { %146 = vsyncpa [#allocation3], 1 }
 0x112   :  { %147 = vsyncpa [#allocation4], 1 }

</bundles_post_ra>
